<compile_context>
chip_gen: v7x
topology: tpu7x:2x2x1
jax: 0.10.0
libtpu: 0.0.40
codegen_flags: <defaults>
</compile_context>

<pallas_src>
import functools

import jax
import jax.numpy as jnp
from jax.experimental import pallas as pl
from jax.experimental.pallas import tpu as pltpu


def _round_up(x, m):
    return ((x + m - 1) // m) * m


# Sublane alignment that is native for both f32 (8) and bf16 (16) tiles, so
# every batch-block offset lands on a layout-tile boundary for input and output.
_SUBLANE_ALIGN = 16


def actor_kernel(x_ref, wp_ref, o_ref, *, input_size):
    """One batch tile of the fused 3-layer MLP (ReLU after every layer).

    x_ref  : (BT, input_size) f32  — raw states (batch-padded only).
    wp_ref : (3, P, P)        bf16 — packed [W ; bias-row ; carry-1] slabs.
    o_ref  : (BT, P)          bf16 — lane-dense padded output.
    """
    P = wp_ref.shape[-1]
    BT = x_ref.shape[0]
    cdtype = wp_ref.dtype

    # Build the lane-dense MXU operand in-register:
    #   [ state | 1.0 (bias lane at column `input_size`) | zeros ]  -> (BT, P)
    s = x_ref[...]
    one = jnp.ones((BT, 1), jnp.float32)
    pad = jnp.zeros((BT, P - input_size - 1), jnp.float32)
    x = jnp.concatenate([s, one, pad], axis=-1).astype(cdtype)

    # The packed weights carry the 1.0 bias lane through layers 1 and 2, so the
    # body is just three dot+ReLU pairs; accumulation stays in f32.
    h1 = jnp.maximum(jnp.dot(x, wp_ref[0], preferred_element_type=jnp.float32), 0.0)
    h2 = jnp.maximum(
        jnp.dot(h1.astype(cdtype), wp_ref[1], preferred_element_type=jnp.float32), 0.0)
    h3 = jnp.maximum(
        jnp.dot(h2.astype(cdtype), wp_ref[2], preferred_element_type=jnp.float32), 0.0)
    o_ref[...] = h3.astype(o_ref.dtype)


def pack_actor_params(params, input_size, hidden_size, output_size,
                      dtype=jnp.bfloat16):
    """Pack W1,b1,W2,b2,W3,b3 into one lane-dense (3, P, P) buffer (done once).

    Layout of slab l (fan_in x fan_out weights):
      rows [:fan_in, :fan_out]   = W_l
      row  bias_row, [:fan_out]  = b_l          (picked up by the 1.0 lane)
      row  bias_row, carry_col   = 1.0          (propagates the 1.0 lane; l<3)
    """
    P = max(_round_up(input_size + 1, 128),
            _round_up(hidden_size + 1, 128),
            _round_up(output_size, 128))
    assert input_size + 1 <= P and hidden_size + 1 <= P and output_size <= P, (
        "bias/carry lane does not fit in the padded width")

    def slab(w, b, fan_in, bias_row, carry_col=None):
        fan_out = w.shape[1]
        m = jnp.zeros((P, P), jnp.float32)
        m = m.at[:fan_in, :fan_out].set(w)
        m = m.at[bias_row, :fan_out].set(b.reshape(-1))
        if carry_col is not None:
            m = m.at[bias_row, carry_col].set(1.0)
        return m

    packed = jnp.stack([
        slab(params["w1"], params["b1"], input_size, input_size, hidden_size),
        slab(params["w2"], params["b2"], hidden_size, hidden_size, hidden_size),
        slab(params["w3"], params["b3"], hidden_size, hidden_size, None),
    ])
    return packed.astype(dtype)


def _select_tiles(batch, max_tile):
    """Pick (BT, Bp, n_tiles): minimal-waste tiles, >=2 tiles for non-tiny B."""
    ba = _round_up(batch, _SUBLANE_ALIGN)
    if ba <= 128:
        n_tiles = 1                      # latency regime: one small tile
    else:
        n_tiles = max(2, pl.cdiv(ba, max_tile))   # >=2 tiles -> 2 TCs on v7x
    bt = _round_up(pl.cdiv(ba, n_tiles), _SUBLANE_ALIGN)
    return bt, bt * n_tiles, n_tiles


@functools.partial(
    jax.jit,
    static_argnames=("input_size", "hidden_size", "output_size", "batch_tile"))
def actor_forward(state, packed_params, *, input_size, hidden_size, output_size,
                  batch_tile=1024):
    """state: (B, input_size). Returns (B, output_size) f32."""
    B = state.shape[0]
    P = packed_params.shape[-1]

    BT, Bp, n_tiles = _select_tiles(B, batch_tile)

    state_f32 = state.astype(jnp.float32)
    if Bp != B:
        state_f32 = jnp.pad(state_f32, ((0, Bp - B), (0, 0)))

    out = pl.pallas_call(
        functools.partial(actor_kernel, input_size=input_size),
        out_shape=jax.ShapeDtypeStruct((Bp, P), jnp.bfloat16),
        grid=(n_tiles,),
        in_specs=[
            # Raw states: full-extent last dim, batch tiled.
            pl.BlockSpec((BT, input_size), lambda i: (i, 0)),
            # Packed weights: constant index_map -> DMA'd once, VMEM-resident.
            pl.BlockSpec((3, P, P), lambda i: (0, 0, 0)),
        ],
        out_specs=pl.BlockSpec((BT, P), lambda i: (i, 0)),
        compiler_params=pltpu.CompilerParams(
            dimension_semantics=("parallel",),   # shard batch tiles over TCs
        ),
    )(state_f32, packed_params)

    return out[:B, :output_size].astype(jnp.float32)


def init_actor_params(key, input_size, hidden_size, output_size):
    """Deterministic init mimicking nn.Linear's U(-1/sqrt(fan_in), 1/sqrt(fan_in))."""
    ks = jax.random.split(key, 6)

    def linear(kw, kb, fan_in, fan_out):
        bound = 1.0 / jnp.sqrt(jnp.float32(fan_in))
        w = jax.random.uniform(kw, (fan_in, fan_out), jnp.float32, -bound, bound)
        b = jax.random.uniform(kb, (fan_out,), jnp.float32, -bound, bound)
        return w, b

    w1, b1 = linear(ks[0], ks[1], input_size, hidden_size)
    w2, b2 = linear(ks[2], ks[3], hidden_size, hidden_size)
    w3, b3 = linear(ks[4], ks[5], hidden_size, output_size)
    return {"w1": w1, "b1": b1, "w2": w2, "b2": b2, "w3": w3, "b3": b3}


def actor_ref(state, p):
    h1 = jnp.maximum(state @ p["w1"] + p["b1"], 0.0)
    h2 = jnp.maximum(h1 @ p["w2"] + p["b2"], 0.0)
    return jnp.maximum(h2 @ p["w3"] + p["b3"], 0.0)  # final ReLU matches the spec


# TODO(synk): the Adam optimizer / learning_rate in the PyTorch module are training
# state, not part of the forward pass, and are intentionally not implemented.

if __name__ == "__main__":
    # Walker-ish sizes: obs dim 24, hidden 32, action dim 6.
    input_size, hidden_size, output_size = 24, 32, 6

    key = jax.random.PRNGKey(0)
    k_state, k_state2, k_params = jax.random.split(key, 3)
    params = init_actor_params(k_params, input_size, hidden_size, output_size)
    packed = pack_actor_params(params, input_size, hidden_size, output_size)

    # 1) Small latency-style batch (single grid step, single small tile).
    state_small = jax.random.normal(k_state, (8, input_size), jnp.float32)
    out_small = jax.block_until_ready(
        actor_forward(state_small, packed, input_size=input_size,
                      hidden_size=hidden_size, output_size=output_size))
    ref_small = actor_ref(state_small, params)
    assert out_small.shape == (8, output_size)
    assert jnp.allclose(out_small, ref_small, atol=5e-2, rtol=5e-2), float(
        jnp.max(jnp.abs(out_small - ref_small)))

    # 2) Larger vectorized-env batch: exercises the minimal-waste 2-tile split
    #    (BT=160, Bp=320) with the packed weights held resident in VMEM and the
    #    parallel batch axis available for both TensorCores on v7x.
    state_big = jax.random.normal(k_state2, (300, input_size), jnp.float32)
    out_big = jax.block_until_ready(
        actor_forward(state_big, packed, input_size=input_size,
                      hidden_size=hidden_size, output_size=output_size))
    ref_big = actor_ref(state_big, params)
    assert out_big.shape == (300, output_size)
    assert jnp.allclose(out_big, ref_big, atol=5e-2, rtol=5e-2), float(
        jnp.max(jnp.abs(out_big - ref_big)))

    print("KERNEL_OK")
</pallas_src>

<mosaic_0001>
module attributes {stable_mosaic.version = 11 : i64} {
  func.func @actor_kernel(%arg0: i32, %arg1: memref<16x24xf32, #tpu.memory_space<vmem>>, %arg2: memref<3x128x128xbf16, #tpu.memory_space<vmem>>, %arg3: memref<16x128xbf16, #tpu.memory_space<vmem>>) attributes {dimension_semantics = [#tpu.dimension_semantics<parallel>], iteration_bounds = array<i64: 1>, scalar_prefetch = 0 : i64, scratch_operands = 0 : i64, tpu.core_type = #tpu.core_type<tc>, window_params = [{transform_indices = @transform_0, window_bounds = array<i64: 16, 24>}, {pipeline_mode = #tpu.pipeline_mode<synchronous>, transform_indices = @transform_1, window_bounds = array<i64: 3, 128, 128>}, {transform_indices = @transform_2, window_bounds = array<i64: 16, 128>}]} {
    %c0 = arith.constant 0 : index
    %c0_0 = arith.constant 0 : index
    %0 = vector.load %arg1[%c0, %c0_0] : memref<16x24xf32, #tpu.memory_space<vmem>>, vector<16x24xf32>
    %cst = arith.constant 1.000000e+00 : f32
    %1 = vector.broadcast %cst : f32 to vector<16x1xf32>
    %cst_1 = arith.constant 0.000000e+00 : f32
    %2 = vector.broadcast %cst_1 : f32 to vector<16x103xf32>
    %3 = tpu.concatenate %0, %1, %2 in 1 : vector<16x24xf32>, vector<16x1xf32>, vector<16x103xf32> -> vector<16x128xf32>
    %4 = arith.truncf %3 : vector<16x128xf32> to vector<16x128xbf16>
    %c0_2 = arith.constant 0 : index
    %c0_3 = arith.constant 0 : index
    %c0_4 = arith.constant 0 : index
    %5 = vector.load %arg2[%c0_2, %c0_3, %c0_4] : memref<3x128x128xbf16, #tpu.memory_space<vmem>>, vector<1x128x128xbf16>
    %6 = vector.shape_cast %5 : vector<1x128x128xbf16> to vector<128x128xbf16>
    %cst_5 = arith.constant dense<0.000000e+00> : vector<16x128xf32>
    %7 = tpu.matmul %4, %6, %cst_5 {dimension_numbers = #tpu.dot_dimension_numbers<[1], [0], [0], [1], [0, 0, 1, 1], [], []>} : vector<16x128xbf16>, vector<128x128xbf16>, vector<16x128xf32> -> vector<16x128xf32>
    %cst_6 = arith.constant 0.000000e+00 : f32
    %8 = vector.broadcast %cst_6 : f32 to vector<16x128xf32>
    %9 = arith.maximumf %7, %8 : vector<16x128xf32>
    %10 = arith.truncf %9 : vector<16x128xf32> to vector<16x128xbf16>
    %c1 = arith.constant 1 : index
    %c0_7 = arith.constant 0 : index
    %c0_8 = arith.constant 0 : index
    %11 = vector.load %arg2[%c1, %c0_7, %c0_8] : memref<3x128x128xbf16, #tpu.memory_space<vmem>>, vector<1x128x128xbf16>
    %12 = vector.shape_cast %11 : vector<1x128x128xbf16> to vector<128x128xbf16>
    %cst_9 = arith.constant dense<0.000000e+00> : vector<16x128xf32>
    %13 = tpu.matmul %10, %12, %cst_9 {dimension_numbers = #tpu.dot_dimension_numbers<[1], [0], [0], [1], [0, 0, 1, 1], [], []>} : vector<16x128xbf16>, vector<128x128xbf16>, vector<16x128xf32> -> vector<16x128xf32>
    %cst_10 = arith.constant 0.000000e+00 : f32
    %14 = vector.broadcast %cst_10 : f32 to vector<16x128xf32>
    %15 = arith.maximumf %13, %14 : vector<16x128xf32>
    %16 = arith.truncf %15 : vector<16x128xf32> to vector<16x128xbf16>
    %c2 = arith.constant 2 : index
    %c0_11 = arith.constant 0 : index
    %c0_12 = arith.constant 0 : index
    %17 = vector.load %arg2[%c2, %c0_11, %c0_12] : memref<3x128x128xbf16, #tpu.memory_space<vmem>>, vector<1x128x128xbf16>
    %18 = vector.shape_cast %17 : vector<1x128x128xbf16> to vector<128x128xbf16>
    %cst_13 = arith.constant dense<0.000000e+00> : vector<16x128xf32>
    %19 = tpu.matmul %16, %18, %cst_13 {dimension_numbers = #tpu.dot_dimension_numbers<[1], [0], [0], [1], [0, 0, 1, 1], [], []>} : vector<16x128xbf16>, vector<128x128xbf16>, vector<16x128xf32> -> vector<16x128xf32>
    %cst_14 = arith.constant 0.000000e+00 : f32
    %20 = vector.broadcast %cst_14 : f32 to vector<16x128xf32>
    %21 = arith.maximumf %19, %20 : vector<16x128xf32>
    %22 = arith.truncf %21 : vector<16x128xf32> to vector<16x128xbf16>
    %c0_15 = arith.constant 0 : index
    %c0_16 = arith.constant 0 : index
    %23 = vector.load %arg3[%c0_15, %c0_16] : memref<16x128xbf16, #tpu.memory_space<vmem>>, vector<16x128xbf16>
    tpu.vector_store %arg3[%c0_15, %c0_16], %22 {strides = array<i32>} : memref<16x128xbf16, #tpu.memory_space<vmem>>, vector<16x128xbf16>,
    return
  }
  func.func @transform_0(%arg0: i32) -> (i32, i32) {
    %c0_i32 = arith.constant 0 : i32
    %c0_i32_0 = arith.constant 0 : i32
    return %arg0, %c0_i32 : i32, i32
  }
  func.func @transform_1(%arg0: i32) -> (i32, i32, i32) {
    %c0_i32 = arith.constant 0 : i32
    %c0_i32_0 = arith.constant 0 : i32
    %c0_i32_1 = arith.constant 0 : i32
    %c0_i32_2 = arith.constant 0 : i32
    return %c0_i32, %c0_i32_0, %c0_i32_1 : i32, i32, i32
  }
  func.func @transform_2(%arg0: i32) -> (i32, i32) {
    %c0_i32 = arith.constant 0 : i32
    %c0_i32_0 = arith.constant 0 : i32
    return %arg0, %c0_i32 : i32, i32
  }
}

</mosaic_0001>

<bundles_post_ra>
// kernel: actor_forward.1
= control target key start
LH: loop header
LB: loop body
LE: loop exit
PB: predicated region body
PF: predicated region fallthrough
CT: control target
= control target key end

     0   :  { %7 = vsyncpa [#allocation3], 0  ;;  %s551_s9 = smov [#allocation2]   ;;  %s622_s0 = inlined_call_operand.vmem [shape: f32[16,24], index: 0, kind: input, shape index: {}]   ;;  %s623_s1 = inlined_call_operand.hbm [shape: bf16[3,128,128], index: 1, kind: input, shape index: {}]   ;;  %s624_s2 = inlined_call_operand.vmem [shape: bf16[16,128], index: 2, kind: output, shape index: {}]  }
   0x1   :  { %s15_s10 = sshll.u32 %s551_s9, 4  ;;  %s527_s13 = scalar_lea.hbm %s623_s1, 3072  ;;  %s16_s10 = int_to_ptr.vmem [resolvable:$true] %s15_s10 }
   0x2   :  { %p528_p0 = scmp.ne.s32.totalorder %s623_s1, %s527_s13  ;;  %p531_p1 = scmp.lt.u32.totalorder %s527_s13, %s623_s1 }
   0x4   :  { %p533_p2 = pnand %p531_p1, %p528_p0 }
   0x6   :  { %536 = shalt.err (!%p533_p2)
}
   0x7   :  { %s537_s18 = scalar_lea.vmem %s16_s10, 3072  ;;  %p542_p4 = scmp.lt.s32.totalorder %s16_s10, %s16_s10 }
   0x8   :  { %p538_p3 = scmp.ne.s32.totalorder %s16_s10, %s537_s18  ;;  %p543_p5 = scmp.lt.s32.totalorder %s537_s18, %s537_s18 }
   0xa   :  { %p544_p6 = por %p543_p5, %p542_p4 }
   0xc   :  { %p545_p7 = pnand %p544_p6, %p538_p3 }
   0xe   :  { %548 = shalt.err (!%p545_p7)
}
   0xf   :  { %s552_s19 = smov 64   ;;  %s553_s20 = smov 4  }
  0x10   :  { %21 = dma.hbm_to_vmem [thread:$0]  %s623_s1, 3072, %s16_s10, [#allocation3], %s552_s19, %s552_s19, %s553_s20  }
  0x11   :  { %549 = dma.done.wait [#allocation3], 3072  }
  0x12   :  { %550 = vsyncadd [#allocation3], 4294964224  ;;  %v554_v0 = vmov 0.0   ;;  %vm555_vm0 = vmmov 0   ;;  %v503_v1 = vld [vmem:[#allocation2] sm:$0xff]   ;;  %v504_v2 = vld [vmem:[#allocation2 + $0x8] sm:$0xff]  }
  0x13   :  { %438 = vmatprep.subr.bf16.mxu0 %v554_v0  ;;  %454 = vmatprep.mubr.msk.bf16.mxu0 %vm555_vm0, %v554_v0  ;;  %v505_v3 = vld [vmem:[#allocation2 + $0x10] sm:$0xff]   ;;  %v506_v4 = vld [vmem:[#allocation2 + $0x18] sm:$0xff]   ;;  %v511_v5 = vld [vmem:[#allocation2 + $0x40] sm:$0xff]   ;;  %vm28_vm1 = vcmask 195584   ;;  %vm31_vm2 = vcmask 203776  }
  0x14   :  { %458 = vmatprep.subr.bf16.mxu1 %v554_v0  ;;  %474 = vmatprep.mubr.msk.bf16.mxu1 %vm555_vm0, %v554_v0  ;;  %v512_v6 = vld [vmem:[#allocation2 + $0x48] sm:$0xff]   ;;  %v507_v7 = vld [vmem:[#allocation2 + $0x20] sm:$0xff]   ;;  %v513_v8 = vld [vmem:[#allocation2 + $0x50] sm:$0xff]  }
  0x15   :  { %439 = vmatpush3.bf16.msra.mxu0 %v503_v1  ;;  %459 = vmatpush3.bf16.msra.mxu1 %v511_v5  ;;  %v508_v9 = vld [vmem:[#allocation2 + $0x28] sm:$0xff]   ;;  %v514_v10 = vld [vmem:[#allocation2 + $0x58] sm:$0xff]   ;;  %v509_v11 = vld [vmem:[#allocation2 + $0x30] sm:$0xff]  }
  0x16   :  { %440 = vmatprep.subr.bf16.mxu0 %v554_v0  ;;  %460 = vmatprep.subr.bf16.mxu1 %v554_v0  ;;  %v26_v12 = vld [vmem:[%s622_s0] sm:$0xff]  ;;  %v27_v13 = vld [vmem:[%s622_s0 + $0x8] sm:$0xff]  ;;  %v510_v15 = vld [vmem:[#allocation2 + $0x38] sm:$0xff]  }
  0x17   :  { %v515_v14 = vld [vmem:[#allocation2 + $0x60] sm:$0xff]   ;;  %v29_v16 = vsel %vm28_vm1, %v26_v12, 1.0  ;;  %v30_v17 = vsel %vm28_vm1, %v27_v13, 1.0  ;;  %v516_v18 = vld [vmem:[#allocation2 + $0x68] sm:$0xff]   ;;  %vm383_vm3 = vmpackc.low %vm31_vm2, %vm31_vm2 }
  0x18   :  { %v384_v19 = vpack.c.bf16 %v30_v17, %v29_v16  ;;  %v517_v20 = vld [vmem:[#allocation2 + $0x70] sm:$0xff]   ;;  %v518_v21 = vld [vmem:[#allocation2 + $0x78] sm:$0xff]   ;;  %v519_v22 = vld [vmem:[#allocation2 + $0x80] sm:$0xff]  }
  0x19   :  { %441 = vmatpush3.bf16.msra.mxu0 %v504_v2  ;;  %461 = vmatpush3.bf16.msra.mxu1 %v512_v6  ;;  %v520_v23 = vld [vmem:[#allocation2 + $0x88] sm:$0xff]   ;;  %v521_v24 = vld [vmem:[#allocation2 + $0x90] sm:$0xff]   ;;  %v522_v25 = vld [vmem:[#allocation2 + $0x98] sm:$0xff]  }
  0x1a   :  { %442 = vmatprep.subr.bf16.mxu0 %v554_v0  ;;  %462 = vmatprep.subr.bf16.mxu1 %v554_v0  ;;  %v523_v26 = vld [vmem:[#allocation2 + $0xa0] sm:$0xff]   ;;  %v524_v27 = vld [vmem:[#allocation2 + $0xa8] sm:$0xff]   ;;  %v525_v35 = vld [vmem:[#allocation2 + $0xb0] sm:$0xff]  }
  0x1b   :  { %v526_v36 = vld [vmem:[#allocation2 + $0xb8] sm:$0xff]  }
  0x1d   :  { %443 = vmatpush3.bf16.msra.mxu0 %v505_v3  ;;  %463 = vmatpush3.bf16.msra.mxu1 %v513_v8 }
  0x1e   :  { %444 = vmatprep.subr.bf16.mxu0 %v554_v0  ;;  %464 = vmatprep.subr.bf16.mxu1 %v554_v0 }
  0x21   :  { %445 = vmatpush3.bf16.msra.mxu0 %v506_v4  ;;  %465 = vmatpush3.bf16.msra.mxu1 %v514_v10 }
  0x22   :  { %446 = vmatprep.subr.bf16.mxu0 %v554_v0  ;;  %466 = vmatprep.subr.bf16.mxu1 %v554_v0 }
  0x25   :  { %447 = vmatpush3.bf16.msra.mxu0 %v507_v7  ;;  %467 = vmatpush3.bf16.msra.mxu1 %v515_v14 }
  0x26   :  { %448 = vmatprep.subr.bf16.mxu0 %v554_v0  ;;  %468 = vmatprep.subr.bf16.mxu1 %v554_v0 }
  0x29   :  { %449 = vmatpush3.bf16.msra.mxu0 %v508_v9  ;;  %469 = vmatpush3.bf16.msra.mxu1 %v516_v18 }
  0x2a   :  { %450 = vmatprep.subr.bf16.mxu0 %v554_v0  ;;  %470 = vmatprep.subr.bf16.mxu1 %v554_v0 }
  0x2d   :  { %451 = vmatpush3.bf16.msra.mxu0 %v509_v11  ;;  %471 = vmatpush3.bf16.msra.mxu1 %v517_v20 }
  0x2e   :  { %452 = vmatprep.subr.bf16.mxu0 %v554_v0  ;;  %472 = vmatprep.subr.bf16.mxu1 %v554_v0 }
  0x31   :  { %453 = vmatpush3.bf16.msra.mxu0 %v510_v15  ;;  %473 = vmatpush3.bf16.msra.mxu1 %v518_v21 }
  0x32   :  { %478 = vmatprep.subr.bf16.mxu0 %v554_v0 }
  0x34   :  { %455 = vmatmul.mubr.msk.bf16.vlgmr.msra.gmra.mrb[0].mxu0 %vm383_vm3, %v384_v19 }
  0x35   :  { %494 = vmatprep.mubr.msk.bf16.mxu0 %vm555_vm0, %v554_v0  ;;  %479 = vmatpush3.bf16.msra.mxu0 %v519_v22 }
  0x36   :  { %480 = vmatprep.subr.bf16.mxu0 %v554_v0 }
  0x39   :  { %481 = vmatpush3.bf16.msra.mxu0 %v520_v23 }
  0x3a   :  { %482 = vmatprep.subr.bf16.mxu0 %v554_v0 }
  0x3d   :  { %483 = vmatpush3.bf16.msra.mxu0 %v521_v24 }
  0x3e   :  { %484 = vmatprep.subr.bf16.mxu0 %v554_v0 }
  0x41   :  { %485 = vmatpush3.bf16.msra.mxu0 %v522_v25 }
  0x42   :  { %486 = vmatprep.subr.bf16.mxu0 %v554_v0 }
  0x45   :  { %487 = vmatpush3.bf16.msra.mxu0 %v523_v26 }
  0x46   :  { %488 = vmatprep.subr.bf16.mxu0 %v554_v0 }
  0x49   :  { %489 = vmatpush3.bf16.msra.mxu0 %v524_v27 }
  0x4a   :  { %490 = vmatprep.subr.bf16.mxu0 %v554_v0 }
  0x4d   :  { %491 = vmatpush3.bf16.msra.mxu0 %v525_v35 }
  0x4e   :  { %492 = vmatprep.subr.bf16.mxu0 %v554_v0 }
  0x51   :  { %493 = vmatpush3.bf16.msra.mxu0 %v526_v36 }
 0x107   :  { %v133_v28 = vpop.f32.mrb[0].mxu0 }
 0x108   :  { %v456_v29 = vpop.f32.mrb[1].mxu0  ;;  %v140_v31 = vmax.f32 %v133_v28, 0.0 }
 0x109   :  { %v136_v30 = vpop.f32.mrb[2].mxu0 }
 0x10a   :  { %v141_v32 = vmax.f32 %v136_v30, 0.0  ;;  %v457_v33 = vpop.f32.mrb[3].mxu0 }
 0x10c   :  { %v142_v34 = vpack.c.bf16 %v141_v32, %v140_v31 }
 0x10e   :  { %475 = vmatmul.mubr.bf16.vlgmr.msra.gmra.mrb[0].mxu1 %v142_v34 }
 0x1e1   :  { %v242_v37 = vpop.f32.mrb[0].mxu1 }
 0x1e2   :  { %v476_v38 = vpop.f32.mrb[1].mxu1  ;;  %v249_v40 = vmax.f32 %v242_v37, 0.0 }
 0x1e3   :  { %v245_v39 = vpop.f32.mrb[2].mxu1 }
 0x1e4   :  { %v250_v41 = vmax.f32 %v245_v39, 0.0  ;;  %v477_v42 = vpop.f32.mrb[3].mxu1 }
 0x1e6   :  { %v251_v43 = vpack.c.bf16 %v250_v41, %v249_v40 }
 0x1e8   :  { %495 = vmatmul.mubr.bf16.vlgmr.msra.gmra.mrb[4].mxu0 %v251_v43 }
 0x2bb   :  { %v351_v44 = vpop.f32.mrb[4].mxu0 }
 0x2bc   :  { %v496_v45 = vpop.f32.mrb[5].mxu0  ;;  %v358_v47 = vmax.f32 %v351_v44, 0.0 }
 0x2bd   :  { %v354_v46 = vpop.f32.mrb[6].mxu0 }
 0x2be   :  { %v359_v48 = vmax.f32 %v354_v46, 0.0  ;;  %v497_v49 = vpop.f32.mrb[7].mxu0 }
 0x2c0   :  { %v409_v50 = vpack.c.bf16 %v359_v48, %v358_v47 }
 0x2c2   :  { %410 = vst [vmem:[%s624_s2] sm:$0xff] %v409_v50  }
 0x2c3   :  { %374 = vsyncpa [#allocation3], 1 }

</bundles_post_ra>
